<compile_context>
chip_gen: v7x
topology: tpu7x:2x2x1
jax: 0.10.0
libtpu: 0.0.40
codegen_flags: <defaults>
</compile_context>

<pallas_src>
import jax
import jax.numpy as jnp
from jax import lax
from jax.experimental import pallas as pl
from jax.experimental.pallas import tpu as pltpu

BN_EPS = 1e-5


def _round_up(x, m):
    return (x + m - 1) // m * m


# ---------------------------------------------------------------------------
# Pallas kernel: two MXU stages, BN folded, one lane-dense output store.
# ---------------------------------------------------------------------------
def skip_kernel(patches_ref, w1_ref, b1_ref, w2_ref, ws_ref, bcat_ref, out_ref):
    p = patches_ref[...]

    # conv_1 (3x3, stride 2) + folded BN + ReLU
    y1 = jnp.dot(p, w1_ref[...], preferred_element_type=jnp.float32)
    y1 = jnp.maximum(y1 + b1_ref[...], 0.0)

    # Fused second stage: out = relu( y1 @ W2cat + patches @ Wscat + bcat ).
    # W2cat holds conv_2 (BN-folded) in columns [:C2]; Wscat holds the shortcut 1x1
    # (BN-folded) in columns [C2:2*C2] with non-zero rows only at the centre im2col
    # tap (== stride-2 subsample of x).  Single full-width store -> no masked vst.
    w2 = w2_ref[...]
    z = jnp.dot(y1.astype(w2.dtype), w2, preferred_element_type=jnp.float32)
    z = z + jnp.dot(p, ws_ref[...], preferred_element_type=jnp.float32)
    z = z + bcat_ref[...]
    out_ref[...] = jnp.maximum(z, 0.0).astype(out_ref.dtype)


# ---------------------------------------------------------------------------
# Glue: im2col / BN folding / padding / parameter packing (plain JAX).
# ---------------------------------------------------------------------------
def im2col_3x3_s2_p1(x_nhwc):
    """3x3 stride-2 pad-1 patches, tap-major / channel-minor.  (N*Ho*Wo, 9*C)."""
    n, h, w, c = x_nhwc.shape
    ho, wo = h // 2, w // 2
    xp = jnp.pad(x_nhwc, ((0, 0), (1, 1), (1, 1), (0, 0)))
    taps = []
    for ky in range(3):
        for kx in range(3):
            taps.append(xp[:, ky:ky + 2 * ho:2, kx:kx + 2 * wo:2, :])
    patches = jnp.stack(taps, axis=3)            # (N, Ho, Wo, 9, C)
    return patches.reshape(n * ho * wo, 9 * c)


def bn_scale_shift(gamma, beta, mean, var):
    scale = gamma * lax.rsqrt(var + BN_EPS)
    shift = beta - mean * scale
    return scale, shift


def skip_connection_forward(x_nhwc, params, *, m_tile=512, dtype=jnp.float32):
    """SkipConnection forward with the Pallas kernel.  Returns NHWC."""
    n, h, w, c0 = x_nhwc.shape
    if h % 2 or w % 2:
        raise ValueError("SkipConnection kernel requires even H and W")
    ho, wo = h // 2, w // 2
    m = n * ho * wo

    (w1_t, b1, w2_t, b2, ws_t, bs,
     g1, be1, m1, v1, g2, be2, m2, v2, gs, bes, ms, vs) = params
    c1 = w1_t.shape[0]
    c2 = w2_t.shape[0]

    # torch (O, I, kh, kw) -> (kh*kw*I, O); matches im2col tap-major / channel-minor.
    w1 = jnp.transpose(w1_t, (2, 3, 1, 0)).reshape(9 * c0, c1)
    w2 = jnp.transpose(w2_t, (2, 3, 1, 0)).reshape(c1, c2)
    ws = jnp.transpose(ws_t, (2, 3, 1, 0)).reshape(c0, c2)

    # Fold BN (inference affine) into the conv weights/biases (tiny wrapper-side work).
    s1, t1 = bn_scale_shift(g1, be1, m1, v1)
    s2, t2 = bn_scale_shift(g2, be2, m2, v2)
    ss, ts = bn_scale_shift(gs, bes, ms, vs)
    w1f, b1f = w1 * s1[None, :], b1 * s1 + t1
    w2f, b2f = w2 * s2[None, :], b2 * s2 + t2
    wsf, bsf = ws * ss[None, :], bs * ss + ts

    # Pad channel dims to multiples of 128: full MXU tiles, unmasked lane-dense stores.
    kp = _round_up(9 * c0, 128)
    c1p = _round_up(c1, 128)
    npad = _round_up(2 * c2, 128)

    w1p = jnp.zeros((kp, c1p), jnp.float32).at[:9 * c0, :c1].set(w1f)
    b1p = jnp.zeros((1, c1p), jnp.float32).at[0, :c1].set(b1f)
    w2cat = jnp.zeros((c1p, npad), jnp.float32).at[:c1, :c2].set(w2f)
    # shortcut weight embedded at the centre-tap rows (tap index 4 -> stride-2 x)
    wscat = jnp.zeros((kp, npad), jnp.float32).at[4 * c0:5 * c0, c2:2 * c2].set(wsf)
    bcat = (jnp.zeros((1, npad), jnp.float32)
            .at[0, :c2].set(b2f).at[0, c2:2 * c2].set(bsf))

    # im2col + M-tiling (pad rows up to a multiple of the tile).
    patches = im2col_3x3_s2_p1(x_nhwc)                       # (M, 9*C0)
    mt = min(_round_up(m, 8), _round_up(m_tile, 8))
    mp = _round_up(m, mt)
    patches_p = jnp.zeros((mp, kp), jnp.float32).at[:m, :9 * c0].set(patches)

    # Compute dtype (bf16 halves HBM traffic on v6e/v7x; f32 for tight checks).
    patches_p = patches_p.astype(dtype)
    w1p = w1p.astype(dtype)
    w2cat = w2cat.astype(dtype)
    wscat = wscat.astype(dtype)

    isize = jnp.dtype(dtype).itemsize
    # Double-buffered input/output tiles + resident weights, with headroom; cap at
    # 32 MiB so the same budget is valid on v5e/v6e (128 MiB) and v7x (64 MiB).
    vmem_need = (2 * (mt * kp * isize + mt * npad * 4)
                 + (kp * c1p + c1p * npad + kp * npad) * isize
                 + (c1p + npad) * 4)
    vmem_limit = int(min(max(4 * vmem_need, 8 << 20), 32 << 20))

    cost = pl.CostEstimate(
        flops=int(2 * m * (9 * c0 * c1 + c1 * c2 + c0 * c2)),
        transcendentals=0,
        bytes_accessed=int(patches_p.size * isize + mp * npad * 4
                           + (w1p.size + w2cat.size + wscat.size) * isize),
    )

    resident = lambda i: (0, 0)
    out_flat = pl.pallas_call(
        skip_kernel,
        out_shape=jax.ShapeDtypeStruct((mp, npad), jnp.float32),
        grid_spec=pltpu.PrefetchScalarGridSpec(
            num_scalar_prefetch=0,
            grid=(mp // mt,),
            in_specs=[
                pl.BlockSpec((mt, kp), lambda i: (i, 0)),     # patches: tiled over M
                pl.BlockSpec((kp, c1p), resident),            # W1 (BN folded)
                pl.BlockSpec((1, c1p), resident),             # b1 (BN folded)
                pl.BlockSpec((c1p, npad), resident),          # W2cat
                pl.BlockSpec((kp, npad), resident),           # Wscat
                pl.BlockSpec((1, npad), resident),            # bcat
            ],
            out_specs=pl.BlockSpec((mt, npad), lambda i: (i, 0)),
        ),
        compiler_params=pltpu.CompilerParams(
            dimension_semantics=("parallel",),
            vmem_limit_bytes=vmem_limit,
        ),
        cost_estimate=cost,
    )(patches_p, w1p, b1p, w2cat, wscat, bcat)

    return out_flat[:m, :2 * c2].reshape(n, ho, wo, 2 * c2)


# ---------------------------------------------------------------------------
# Pure-JAX reference (lax.conv) for correctness checking.
# ---------------------------------------------------------------------------
def reference_forward(x_nhwc, params):
    (w1_t, b1, w2_t, b2, ws_t, bs,
     g1, be1, m1, v1, g2, be2, m2, v2, gs, bes, ms, vs) = params
    dn = ('NHWC', 'HWIO', 'NHWC')
    s1, t1 = bn_scale_shift(g1, be1, m1, v1)
    s2, t2 = bn_scale_shift(g2, be2, m2, v2)
    ss, ts = bn_scale_shift(gs, bes, ms, vs)

    o = lax.conv_general_dilated(x_nhwc, jnp.transpose(w1_t, (2, 3, 1, 0)),
                                 (2, 2), [(1, 1), (1, 1)], dimension_numbers=dn) + b1
    o = jnp.maximum(o * s1 + t1, 0.0)
    o = lax.conv_general_dilated(o, jnp.transpose(w2_t, (2, 3, 1, 0)),
                                 (1, 1), [(0, 0), (0, 0)], dimension_numbers=dn) + b2
    o = o * s2 + t2
    sc = lax.conv_general_dilated(x_nhwc, jnp.transpose(ws_t, (2, 3, 1, 0)),
                                  (2, 2), [(0, 0), (0, 0)], dimension_numbers=dn) + bs
    sc = sc * ss + ts
    return jnp.maximum(jnp.concatenate([o, sc], axis=-1), 0.0)


if __name__ == "__main__":
    # channels = (4, 8, 8); input NCHW (2, 4, 16, 16) -> kernel uses NHWC (2, 16, 16, 4)
    channels = (4, 8, 8)
    c0, c1, c2 = channels
    n, h, w = 2, 16, 16

    key = jax.random.PRNGKey(0)
    k = jax.random.split(key, 8)

    x_nchw = jax.random.normal(k[0], (n, c0, h, w), dtype=jnp.float32)
    x_nhwc = jnp.transpose(x_nchw, (0, 2, 3, 1))

    # Conv weights (torch layout O,I,kh,kw) + biases, deterministic init.
    w1_t = 0.1 * jax.random.normal(k[1], (c1, c0, 3, 3), dtype=jnp.float32)
    b1 = 0.1 * jax.random.normal(k[2], (c1,), dtype=jnp.float32)
    w2_t = 0.1 * jax.random.normal(k[3], (c2, c1, 1, 1), dtype=jnp.float32)
    b2 = 0.1 * jax.random.normal(k[4], (c2,), dtype=jnp.float32)
    ws_t = 0.1 * jax.random.normal(k[5], (c2, c0, 1, 1), dtype=jnp.float32)
    bs = 0.1 * jax.random.normal(k[6], (c2,), dtype=jnp.float32)

    # BatchNorm params: PyTorch __init__ defaults (inference-mode statistics).
    ones = lambda c: jnp.ones((c,), jnp.float32)
    zeros = lambda c: jnp.zeros((c,), jnp.float32)
    params = (w1_t, b1, w2_t, b2, ws_t, bs,
              ones(c1), zeros(c1), zeros(c1), ones(c1),
              ones(c2), zeros(c2), zeros(c2), ones(c2),
              ones(c2), zeros(c2), zeros(c2), ones(c2))

    out = skip_connection_forward(x_nhwc, params, m_tile=512, dtype=jnp.float32)
    out = jax.block_until_ready(out)

    ref = reference_forward(x_nhwc, params)
    assert out.shape == (n, h // 2, w // 2, 2 * c2), out.shape
    assert jnp.allclose(out, ref, atol=1e-4, rtol=1e-4), \
        float(jnp.max(jnp.abs(out - ref)))

    print("KERNEL_OK")
</pallas_src>

<mosaic_0001>
module attributes {stable_mosaic.version = 11 : i64} {
  func.func @skip_kernel(%arg0: i32, %arg1: memref<128x128xf32, #tpu.memory_space<vmem>>, %arg2: memref<128x128xf32, #tpu.memory_space<vmem>>, %arg3: memref<1x128xf32, #tpu.memory_space<vmem>>, %arg4: memref<128x128xf32, #tpu.memory_space<vmem>>, %arg5: memref<128x128xf32, #tpu.memory_space<vmem>>, %arg6: memref<1x128xf32, #tpu.memory_space<vmem>>, %arg7: memref<128x128xf32, #tpu.memory_space<vmem>>) attributes {dimension_semantics = [#tpu.dimension_semantics<parallel>], iteration_bounds = array<i64: 1>, scalar_prefetch = 0 : i64, scratch_operands = 0 : i64, tpu.core_type = #tpu.core_type<tc>, window_params = [{transform_indices = @transform_0, window_bounds = array<i64: 128, 128>}, {pipeline_mode = #tpu.pipeline_mode<synchronous>, transform_indices = @transform_1, window_bounds = array<i64: 128, 128>}, {pipeline_mode = #tpu.pipeline_mode<synchronous>, transform_indices = @transform_2, window_bounds = array<i64: 1, 128>}, {pipeline_mode = #tpu.pipeline_mode<synchronous>, transform_indices = @transform_3, window_bounds = array<i64: 128, 128>}, {pipeline_mode = #tpu.pipeline_mode<synchronous>, transform_indices = @transform_4, window_bounds = array<i64: 128, 128>}, {pipeline_mode = #tpu.pipeline_mode<synchronous>, transform_indices = @transform_5, window_bounds = array<i64: 1, 128>}, {transform_indices = @transform_6, window_bounds = array<i64: 128, 128>}]} {
    %c0 = arith.constant 0 : index
    %c0_0 = arith.constant 0 : index
    %0 = vector.load %arg1[%c0, %c0_0] : memref<128x128xf32, #tpu.memory_space<vmem>>, vector<128x128xf32>
    %c0_1 = arith.constant 0 : index
    %c0_2 = arith.constant 0 : index
    %1 = vector.load %arg2[%c0_1, %c0_2] : memref<128x128xf32, #tpu.memory_space<vmem>>, vector<128x128xf32>
    %cst = arith.constant dense<0.000000e+00> : vector<128x128xf32>
    %2 = tpu.matmul %0, %1, %cst {dimension_numbers = #tpu.dot_dimension_numbers<[1], [0], [0], [1], [0, 0, 1, 1], [], []>} : vector<128x128xf32>, vector<128x128xf32>, vector<128x128xf32> -> vector<128x128xf32>
    %c0_3 = arith.constant 0 : index
    %c0_4 = arith.constant 0 : index
    %3 = vector.load %arg3[%c0_3, %c0_4] : memref<1x128xf32, #tpu.memory_space<vmem>>, vector<1x128xf32>
    %4 = vector.broadcast %3 : vector<1x128xf32> to vector<128x128xf32>
    %5 = arith.addf %2, %4 : vector<128x128xf32>
    %cst_5 = arith.constant 0.000000e+00 : f32
    %6 = vector.broadcast %cst_5 : f32 to vector<128x128xf32>
    %7 = arith.maximumf %5, %6 : vector<128x128xf32>
    %c0_6 = arith.constant 0 : index
    %c0_7 = arith.constant 0 : index
    %8 = vector.load %arg4[%c0_6, %c0_7] : memref<128x128xf32, #tpu.memory_space<vmem>>, vector<128x128xf32>
    %cst_8 = arith.constant dense<0.000000e+00> : vector<128x128xf32>
    %9 = tpu.matmul %7, %8, %cst_8 {dimension_numbers = #tpu.dot_dimension_numbers<[1], [0], [0], [1], [0, 0, 1, 1], [], []>} : vector<128x128xf32>, vector<128x128xf32>, vector<128x128xf32> -> vector<128x128xf32>
    %c0_9 = arith.constant 0 : index
    %c0_10 = arith.constant 0 : index
    %10 = vector.load %arg5[%c0_9, %c0_10] : memref<128x128xf32, #tpu.memory_space<vmem>>, vector<128x128xf32>
    %cst_11 = arith.constant dense<0.000000e+00> : vector<128x128xf32>
    %11 = tpu.matmul %0, %10, %cst_11 {dimension_numbers = #tpu.dot_dimension_numbers<[1], [0], [0], [1], [0, 0, 1, 1], [], []>} : vector<128x128xf32>, vector<128x128xf32>, vector<128x128xf32> -> vector<128x128xf32>
    %12 = arith.addf %9, %11 : vector<128x128xf32>
    %c0_12 = arith.constant 0 : index
    %c0_13 = arith.constant 0 : index
    %13 = vector.load %arg6[%c0_12, %c0_13] : memref<1x128xf32, #tpu.memory_space<vmem>>, vector<1x128xf32>
    %14 = vector.broadcast %13 : vector<1x128xf32> to vector<128x128xf32>
    %15 = arith.addf %12, %14 : vector<128x128xf32>
    %cst_14 = arith.constant 0.000000e+00 : f32
    %16 = vector.broadcast %cst_14 : f32 to vector<128x128xf32>
    %17 = arith.maximumf %15, %16 : vector<128x128xf32>
    %c0_15 = arith.constant 0 : index
    %c0_16 = arith.constant 0 : index
    %18 = vector.load %arg7[%c0_15, %c0_16] : memref<128x128xf32, #tpu.memory_space<vmem>>, vector<128x128xf32>
    tpu.vector_store %arg7[%c0_15, %c0_16], %17 {strides = array<i32>} : memref<128x128xf32, #tpu.memory_space<vmem>>, vector<128x128xf32>,
    return
  }
  func.func @transform_0(%arg0: i32) -> (i32, i32) {
    %c0_i32 = arith.constant 0 : i32
    %c0_i32_0 = arith.constant 0 : i32
    return %arg0, %c0_i32 : i32, i32
  }
  func.func @transform_1(%arg0: i32) -> (i32, i32) {
    %c0_i32 = arith.constant 0 : i32
    %c0_i32_0 = arith.constant 0 : i32
    %c0_i32_1 = arith.constant 0 : i32
    return %c0_i32, %c0_i32_0 : i32, i32
  }
  func.func @transform_2(%arg0: i32) -> (i32, i32) {
    %c0_i32 = arith.constant 0 : i32
    %c0_i32_0 = arith.constant 0 : i32
    %c0_i32_1 = arith.constant 0 : i32
    return %c0_i32, %c0_i32_0 : i32, i32
  }
  func.func @transform_3(%arg0: i32) -> (i32, i32) {
    %c0_i32 = arith.constant 0 : i32
    %c0_i32_0 = arith.constant 0 : i32
    %c0_i32_1 = arith.constant 0 : i32
    return %c0_i32, %c0_i32_0 : i32, i32
  }
  func.func @transform_4(%arg0: i32) -> (i32, i32) {
    %c0_i32 = arith.constant 0 : i32
    %c0_i32_0 = arith.constant 0 : i32
    %c0_i32_1 = arith.constant 0 : i32
    return %c0_i32, %c0_i32_0 : i32, i32
  }
  func.func @transform_5(%arg0: i32) -> (i32, i32) {
    %c0_i32 = arith.constant 0 : i32
    %c0_i32_0 = arith.constant 0 : i32
    %c0_i32_1 = arith.constant 0 : i32
    return %c0_i32, %c0_i32_0 : i32, i32
  }
  func.func @transform_6(%arg0: i32) -> (i32, i32) {
    %c0_i32 = arith.constant 0 : i32
    %c0_i32_0 = arith.constant 0 : i32
    return %arg0, %c0_i32 : i32, i32
  }
}

</mosaic_0001>

<bundles_post_ra>
// kernel: tpu_custom_call.1
= control target key start
LH: loop header
LB: loop body
LE: loop exit
PB: predicated region body
PF: predicated region fallthrough
CT: control target
= control target key end

     0   :  { %11 = vsyncpa [#allocation3], 0  ;;  %s1367_s0 = inlined_call_operand.hbm [shape: f32[128,128], index: 0, kind: input, shape index: {}]   ;;  %s1368_s1 = inlined_call_operand.hbm [shape: f32[128,128], index: 1, kind: input, shape index: {}]   ;;  %s1369_s2 = inlined_call_operand.vmem [shape: f32[1,128], index: 2, kind: input, shape index: {}]   ;;  %s1370_s3 = inlined_call_operand.hbm [shape: f32[128,128], index: 3, kind: input, shape index: {}]   ;;  %s1371_s4 = inlined_call_operand.hbm [shape: f32[128,128], index: 4, kind: input, shape index: {}]   ;;  %s1372_s5 = inlined_call_operand.vmem [shape: f32[1,128], index: 5, kind: input, shape index: {}]   ;;  %s1373_s6 = inlined_call_operand.hbm [shape: f32[128,128], index: 6, kind: output, shape index: {}]  }
   0x1   :  { %12 = vsyncpa [#allocation6], 0 }
   0x2   :  { %13 = vsyncpa [#allocation9], 0 }
   0x3   :  { %14 = vsyncpa [#allocation4], 0  ;;  %s1194_s21 = smov [#allocation5]   ;;  %s1195_s23 = smov [#allocation2]  }
   0x4   :  { %s32_s22 = sshll.u32 %s1194_s21, 4  ;;  %s20_s24 = sshll.u32 %s1195_s23, 4  ;;  %s33_s22 = int_to_ptr.vmem [resolvable:$true] %s32_s22  ;;  %s1236_s24 = int_to_ptr.vmem [resolvable:$true] %s20_s24 }
   0x5   :  { %s1076_s27 = scalar_lea.hbm %s1368_s1, 2048 }
   0x6   :  { %p1077_p0 = scmp.ne.s32.totalorder %s1368_s1, %s1076_s27  ;;  %p1080_p1 = scmp.lt.u32.totalorder %s1076_s27, %s1368_s1 }
   0x8   :  { %p1082_p2 = pnand %p1080_p1, %p1077_p0 }
   0xa   :  { %1085 = shalt.err (!%p1082_p2)
}
   0xb   :  { %s1086_s8 = scalar_lea.vmem %s33_s22, 2048  ;;  %p1091_p4 = scmp.lt.s32.totalorder %s33_s22, %s33_s22 }
   0xc   :  { %p1087_p3 = scmp.ne.s32.totalorder %s33_s22, %s1086_s8  ;;  %p1092_p5 = scmp.lt.s32.totalorder %s1086_s8, %s1086_s8 }
   0xe   :  { %p1093_p6 = por %p1092_p5, %p1091_p4 }
  0x10   :  { %p1094_p7 = pnand %p1093_p6, %p1087_p3 }
  0x12   :  { %1097 = shalt.err (!%p1094_p7)
}
  0x13   :  { %s1196_s9 = smov 128   ;;  %s1197_s10 = smov 8  }
  0x14   :  { %38 = dma.hbm_to_vmem [thread:$0]  %s1368_s1, 2048, %s33_s22, [#allocation6], %s1196_s9, %s1196_s9, %s1197_s10  }
  0x15   :  { %s1098_s15 = scalar_lea.hbm %s1367_s0, 2048 }
  0x16   :  { %p1099_p8 = scmp.ne.s32.totalorder %s1367_s0, %s1098_s15  ;;  %p1102_p9 = scmp.lt.u32.totalorder %s1098_s15, %s1367_s0 }
  0x18   :  { %p1104_p10 = pnand %p1102_p9, %p1099_p8 }
  0x1a   :  { %1107 = shalt.err (!%p1104_p10)
}
  0x1b   :  { %s1108_s20 = scalar_lea.vmem %s1236_s24, 2048  ;;  %p1113_p12 = scmp.lt.s32.totalorder %s1236_s24, %s1236_s24 }
  0x1c   :  { %p1109_p11 = scmp.ne.s32.totalorder %s1236_s24, %s1108_s20  ;;  %p1114_p13 = scmp.lt.s32.totalorder %s1108_s20, %s1108_s20 }
  0x1e   :  { %p1115_p0 = por %p1114_p13, %p1113_p12 }
  0x20   :  { %p1116_p1 = pnand %p1115_p0, %p1109_p11 }
  0x22   :  { %1119 = shalt.err (!%p1116_p1)
}
  0x23   :  { %26 = dma.hbm_to_vmem [thread:$0]  %s1367_s0, 2048, %s1236_s24, [#allocation3], %s1196_s9, %s1196_s9, %s1197_s10  }
  0x24   :  { %s1198_s22 = smov [#allocation7]   ;;  %s1199_s25 = smov [#allocation8]  }
  0x25   :  { %s46_s23 = sshll.u32 %s1198_s22, 4  ;;  %s58_s26 = sshll.u32 %s1199_s25, 4  ;;  %s47_s23 = int_to_ptr.vmem [resolvable:$true] %s46_s23  ;;  %s1273_s26 = int_to_ptr.vmem [resolvable:$true] %s58_s26 }
  0x26   :  { %s1120_s29 = scalar_lea.hbm %s1370_s3, 2048 }
  0x27   :  { %p1121_p2 = scmp.ne.s32.totalorder %s1370_s3, %s1120_s29  ;;  %p1124_p3 = scmp.lt.u32.totalorder %s1120_s29, %s1370_s3 }
  0x29   :  { %p1126_p4 = pnand %p1124_p3, %p1121_p2 }
  0x2b   :  { %1129 = shalt.err (!%p1126_p4)
}
  0x2c   :  { %s1130_s0 = scalar_lea.vmem %s47_s23, 2048  ;;  %p1135_p6 = scmp.lt.s32.totalorder %s47_s23, %s47_s23 }
  0x2d   :  { %p1131_p5 = scmp.ne.s32.totalorder %s47_s23, %s1130_s0  ;;  %p1136_p7 = scmp.lt.s32.totalorder %s1130_s0, %s1130_s0 }
  0x2f   :  { %p1137_p8 = por %p1136_p7, %p1135_p6 }
  0x31   :  { %p1138_p9 = pnand %p1137_p8, %p1131_p5 }
  0x33   :  { %1141 = shalt.err (!%p1138_p9)
}
  0x34   :  { %52 = dma.hbm_to_vmem [thread:$0]  %s1370_s3, 2048, %s47_s23, [#allocation6], %s1196_s9, %s1196_s9, %s1197_s10  }
  0x35   :  { %s1142_s15 = scalar_lea.hbm %s1371_s4, 2048 }
  0x36   :  { %p1143_p10 = scmp.ne.s32.totalorder %s1371_s4, %s1142_s15  ;;  %p1146_p11 = scmp.lt.u32.totalorder %s1142_s15, %s1371_s4 }
  0x38   :  { %p1148_p12 = pnand %p1146_p11, %p1143_p10 }
  0x3a   :  { %1151 = shalt.err (!%p1148_p12)
}
  0x3b   :  { %s1152_s20 = scalar_lea.vmem %s1273_s26, 2048  ;;  %p1157_p0 = scmp.lt.s32.totalorder %s1273_s26, %s1273_s26 }
  0x3c   :  { %p1153_p13 = scmp.ne.s32.totalorder %s1273_s26, %s1152_s20  ;;  %p1158_p1 = scmp.lt.s32.totalorder %s1152_s20, %s1152_s20 }
  0x3e   :  { %p1159_p2 = por %p1158_p1, %p1157_p0 }
  0x40   :  { %p1160_p3 = pnand %p1159_p2, %p1153_p13 }
  0x42   :  { %1163 = shalt.err (!%p1160_p3)
}
  0x43   :  { %64 = dma.hbm_to_vmem [thread:$0]  %s1371_s4, 2048, %s1273_s26, [#allocation9], %s1196_s9, %s1196_s9, %s1197_s10  }
  0x44   :  { %1186 = dma.done.wait [#allocation3], 2048  }
  0x45   :  { %1187 = vsyncadd [#allocation3], 4294965248 }
  0x46   :  { %1188 = dma.done.wait [#allocation6], 4096  }
  0x47   :  { %1189 = vsyncadd [#allocation6], 4294963200 }
  0x48   :  { %1190 = dma.done.wait [#allocation9], 2048  }
  0x49   :  { %1191 = vsyncadd [#allocation9], 4294965248  ;;  %v95_v0 = vld [vmem:[#allocation5] sm:$0xff]  ;;  %v96_v1 = vld [vmem:[#allocation5 + $0x8] sm:$0xff] }
  0x4a   :  { %v97_v2 = vld [vmem:[#allocation5 + $0x10] sm:$0xff]  ;;  %v941_v3 = vpack.c.bf16 %v96_v1, %v95_v0  ;;  %v98_v4 = vld [vmem:[#allocation5 + $0x18] sm:$0xff]  ;;  %v99_v6 = vld [vmem:[#allocation5 + $0x20] sm:$0xff] }
  0x4b   :  { %v945_v5 = vpack.c.bf16 %v98_v4, %v97_v2  ;;  %v100_v7 = vld [vmem:[#allocation5 + $0x28] sm:$0xff]  ;;  %v79_v9 = vld [vmem:[#allocation2] sm:$0xff]  ;;  %v101_v10 = vld [vmem:[#allocation5 + $0x30] sm:$0xff] }
  0x4c   :  { %942 = vmatprep.subr.bf16.mxu0 %v941_v3  ;;  %v949_v8 = vpack.c.bf16 %v100_v7, %v99_v6  ;;  %v102_v11 = vld [vmem:[#allocation5 + $0x38] sm:$0xff]  ;;  %805 = vmatprep.mubr.f32.mxu0 %v79_v9  ;;  %v103_v13 = vld [vmem:[#allocation5 + $0x40] sm:$0xff]  ;;  %v104_v14 = vld [vmem:[#allocation5 + $0x48] sm:$0xff] }
  0x4d   :  { %944 = vmatpush3.bf16.msra.mxu0 %v941_v3  ;;  %861 = vmatprep.mubr.f32.mxu1 %v79_v9  ;;  %v953_v12 = vpack.c.bf16 %v102_v11, %v101_v10  ;;  %v295_v15 = vld [vmem:[#allocation8] sm:$0xff]  ;;  %v296_v16 = vld [vmem:[#allocation8 + $0x8] sm:$0xff]  ;;  %v297_v17 = vld [vmem:[#allocation8 + $0x10] sm:$0xff]  ;;  %v957_v21 = vpack.c.bf16 %v104_v14, %v103_v13 }
  0x4e   :  { %946 = vmatprep.subr.bf16.mxu0 %v945_v5  ;;  %v298_v18 = vld [vmem:[#allocation8 + $0x18] sm:$0xff]  ;;  %v973_v19 = vpack.c.bf16 %v296_v16, %v295_v15  ;;  %v299_v22 = vld [vmem:[#allocation8 + $0x20] sm:$0xff]  ;;  %v300_v23 = vld [vmem:[#allocation8 + $0x28] sm:$0xff] }
  0x4f   :  { %v977_v20 = vpack.c.bf16 %v298_v18, %v297_v17  ;;  %v105_v24 = vld [vmem:[#allocation5 + $0x50] sm:$0xff]  ;;  %v106_v25 = vld [vmem:[#allocation5 + $0x58] sm:$0xff]  ;;  %v981_v26 = vpack.c.bf16 %v300_v23, %v299_v22  ;;  %v107_v30 = vld [vmem:[#allocation5 + $0x60] sm:$0xff] }
  0x50   :  { %974 = vmatprep.subr.bf16.mxu1 %v973_v19  ;;  %v961_v27 = vpack.c.bf16 %v106_v25, %v105_v24  ;;  %v301_v28 = vld [vmem:[#allocation8 + $0x30] sm:$0xff]  ;;  %v302_v29 = vld [vmem:[#allocation8 + $0x38] sm:$0xff]  ;;  %v108_v31 = vld [vmem:[#allocation5 + $0x68] sm:$0xff] }
  0x51   :  { %948 = vmatpush3.bf16.msra.mxu0 %v945_v5  ;;  %976 = vmatpush3.bf16.msra.mxu1 %v973_v19  ;;  %v985_v32 = vpack.c.bf16 %v302_v29, %v301_v28  ;;  %v965_v33 = vpack.c.bf16 %v108_v31, %v107_v30  ;;  %v303_v34 = vld [vmem:[#allocation8 + $0x40] sm:$0xff]  ;;  %v304_v35 = vld [vmem:[#allocation8 + $0x48] sm:$0xff]  ;;  %v109_v36 = vld [vmem:[#allocation5 + $0x70] sm:$0xff] }
  0x52   :  { %950 = vmatprep.subr.bf16.mxu0 %v949_v8  ;;  %978 = vmatprep.subr.bf16.mxu1 %v977_v20  ;;  %v110_v37 = vld [vmem:[#allocation5 + $0x78] sm:$0xff]  ;;  %v989_v38 = vpack.c.bf16 %v304_v35, %v303_v34  ;;  %v305_v40 = vld [vmem:[#allocation8 + $0x50] sm:$0xff]  ;;  %v279_v42 = vld [vmem:[#allocation7] sm:$0xff] }
  0x53   :  { %v969_v39 = vpack.c.bf16 %v110_v37, %v109_v36  ;;  %v306_v41 = vld [vmem:[#allocation8 + $0x58] sm:$0xff]  ;;  %v280_v43 = vld [vmem:[#allocation7 + $0x8] sm:$0xff]  ;;  %v281_v46 = vld [vmem:[#allocation7 + $0x10] sm:$0xff] }
  0x54   :  { %v993_v44 = vpack.c.bf16 %v306_v41, %v305_v40  ;;  %v1005_v45 = vpack.c.bf16 %v280_v43, %v279_v42  ;;  %v282_v47 = vld [vmem:[#allocation7 + $0x18] sm:$0xff]  ;;  %v307_v48 = vld [vmem:[#allocation8 + $0x60] sm:$0xff]  ;;  %v308_v49 = vld [vmem:[#allocation8 + $0x68] sm:$0xff] }
  0x55   :  { %952 = vmatpush3.bf16.msra.mxu0 %v949_v8  ;;  %980 = vmatpush3.bf16.msra.mxu1 %v977_v20  ;;  %v80_v50 = vld [vmem:[#allocation2 + $0x8] sm:$0xff]  ;;  %v81_v51 = vld [vmem:[#allocation2 + $0x10] sm:$0xff]  ;;  %v1009_v52 = vpack.c.bf16 %v282_v47, %v281_v46  ;;  %v997_v53 = vpack.c.bf16 %v308_v49, %v307_v48  ;;  %v283_v54 = vld [vmem:[#allocation7 + $0x20] sm:$0xff] }
  0x56   :  { %954 = vmatprep.subr.bf16.mxu0 %v953_v12  ;;  %982 = vmatprep.subr.bf16.mxu1 %v981_v26  ;;  %v284_v55 = vld [vmem:[#allocation7 + $0x28] sm:$0xff]  ;;  %v309_v56 = vld [vmem:[#allocation8 + $0x70] sm:$0xff]  ;;  %v310_v57 = vld [vmem:[#allocation8 + $0x78] sm:$0xff] }
  0x57   :  { %v82_v58 = vld [vmem:[#allocation2 + $0x18] sm:$0xff]  ;;  %v83_v59 = vld [vmem:[#allocation2 + $0x20] sm:$0xff]  ;;  %v1013_v60 = vpack.c.bf16 %v284_v55, %v283_v54  ;;  %v1001_v61 = vpack.c.bf16 %v310_v57, %v309_v56  ;;  %v285_v62 = vld [vmem:[#allocation7 + $0x30] sm:$0xff] }
  0x58   :  { %v286_v63 = vld [vmem:[#allocation7 + $0x38] sm:$0xff]  ;;  %v84_v0 = vld [vmem:[#allocation2 + $0x28] sm:$0xff]  ;;  %v85_v1 = vld [vmem:[#allocation2 + $0x30] sm:$0xff] }
  0x59   :  { %956 = vmatpush3.bf16.msra.mxu0 %v953_v12  ;;  %984 = vmatpush3.bf16.msra.mxu1 %v981_v26  ;;  %v1017_v2 = vpack.c.bf16 %v286_v63, %v285_v62  ;;  %v287_v3 = vld [vmem:[#allocation7 + $0x40] sm:$0xff]  ;;  %v288_v4 = vld [vmem:[#allocation7 + $0x48] sm:$0xff]  ;;  %v86_v5 = vld [vmem:[#allocation2 + $0x38] sm:$0xff] }
  0x5a   :  { %958 = vmatprep.subr.bf16.mxu0 %v957_v21  ;;  %986 = vmatprep.subr.bf16.mxu1 %v985_v32  ;;  %v87_v6 = vld [vmem:[#allocation2 + $0x40] sm:$0xff]  ;;  %v1021_v7 = vpack.c.bf16 %v288_v4, %v287_v3  ;;  %v289_v8 = vld [vmem:[#allocation7 + $0x50] sm:$0xff]  ;;  %v290_v9 = vld [vmem:[#allocation7 + $0x58] sm:$0xff] }
  0x5b   :  { %v88_v10 = vld [vmem:[#allocation2 + $0x48] sm:$0xff]  ;;  %v89_v11 = vld [vmem:[#allocation2 + $0x50] sm:$0xff]  ;;  %v1025_v12 = vpack.c.bf16 %v290_v9, %v289_v8  ;;  %v291_v13 = vld [vmem:[#allocation7 + $0x60] sm:$0xff] }
  0x5c   :  { %v292_v14 = vld [vmem:[#allocation7 + $0x68] sm:$0xff]  ;;  %v90_v15 = vld [vmem:[#allocation2 + $0x58] sm:$0xff]  ;;  %v91_v16 = vld [vmem:[#allocation2 + $0x60] sm:$0xff] }
  0x5d   :  { %960 = vmatpush3.bf16.msra.mxu0 %v957_v21  ;;  %988 = vmatpush3.bf16.msra.mxu1 %v985_v32  ;;  %v1029_v17 = vpack.c.bf16 %v292_v14, %v291_v13  ;;  %v92_v18 = vld [vmem:[#allocation2 + $0x68] sm:$0xff]  ;;  %v93_v19 = vld [vmem:[#allocation2 + $0x70] sm:$0xff]  ;;  %v94_v20 = vld [vmem:[#allocation2 + $0x78] sm:$0xff] }
  0x5e   :  { %962 = vmatprep.subr.bf16.mxu0 %v961_v27  ;;  %990 = vmatprep.subr.bf16.mxu1 %v989_v38  ;;  %v293_v21 = vld [vmem:[#allocation7 + $0x70] sm:$0xff]  ;;  %v294_v22 = vld [vmem:[#allocation7 + $0x78] sm:$0xff]  ;;  %v1313_v24 = vld [vmem:[%s1369_s2] ss:$0 sm:$0xff] }
  0x5f   :  { %v1033_v23 = vpack.c.bf16 %v294_v22, %v293_v21 }
  0x61   :  { %964 = vmatpush3.bf16.msra.mxu0 %v961_v27  ;;  %992 = vmatpush3.bf16.msra.mxu1 %v989_v38 }
  0x62   :  { %966 = vmatprep.subr.bf16.mxu0 %v965_v33  ;;  %994 = vmatprep.subr.bf16.mxu1 %v993_v44 }
  0x65   :  { %968 = vmatpush3.bf16.msra.mxu0 %v965_v33  ;;  %996 = vmatpush3.bf16.msra.mxu1 %v993_v44 }
  0x66   :  { %970 = vmatprep.subr.bf16.mxu0 %v969_v39  ;;  %998 = vmatprep.subr.bf16.mxu1 %v997_v53 }
  0x69   :  { %972 = vmatpush3.bf16.msra.mxu0 %v969_v39  ;;  %1000 = vmatpush3.bf16.msra.mxu1 %v997_v53 }
  0x6a   :  { %1006 = vmatprep.subr.bf16.mxu0 %v1005_v45  ;;  %1002 = vmatprep.subr.bf16.mxu1 %v1001_v61 }
  0x6c   :  { %806 = vmatmul.mubr.f32.vlgmr.msra.gmra.mrb[0].mxu0 %v80_v50 }
  0x6d   :  { %808 = vmatprep.mubr.f32.mxu0 %v81_v51  ;;  %1008 = vmatpush3.bf16.msra.mxu0 %v1005_v45 }
  0x6e   :  { %1010 = vmatprep.subr.bf16.mxu0 %v1009_v52  ;;  %1004 = vmatpush3.bf16.msra.mxu1 %v1001_v61 }
  0x6f   :  { %1037 = vmatprep.subr.bf16.mxu1 %v1005_v45 }
  0x70   :  { %809 = vmatmul.mubr.f32.gmra.mrb[2].mxu0 %v82_v58 }
  0x71   :  { %811 = vmatprep.mubr.f32.mxu0 %v83_v59  ;;  %1012 = vmatpush3.bf16.msra.mxu0 %v1009_v52 }
  0x72   :  { %1014 = vmatprep.subr.bf16.mxu0 %v1013_v60  ;;  %862 = vmatmul.mubr.f32.vlgmr.msra.gmra.mrb[0].mxu1 %v80_v50 }
  0x73   :  { %1045 = vmatpush3.bf16.msra.mxu1 %v1005_v45  ;;  %864 = vmatprep.mubr.f32.mxu1 %v81_v51 }
  0x74   :  { %812 = vmatmul.mubr.f32.gmra.mrb[4].mxu0 %v84_v0  ;;  %1038 = vmatprep.subr.bf16.mxu1 %v1009_v52 }
  0x75   :  { %814 = vmatprep.mubr.f32.mxu0 %v85_v1  ;;  %1016 = vmatpush3.bf16.msra.mxu0 %v1013_v60 }
  0x76   :  { %1018 = vmatprep.subr.bf16.mxu0 %v1017_v2  ;;  %865 = vmatmul.mubr.f32.gmra.mrb[2].mxu1 %v82_v58 }
  0x77   :  { %1046 = vmatpush3.bf16.msra.mxu1 %v1009_v52  ;;  %867 = vmatprep.mubr.f32.mxu1 %v83_v59 }
  0x78   :  { %815 = vmatmul.mubr.f32.gmra.mrb[6].mxu0 %v86_v5  ;;  %1039 = vmatprep.subr.bf16.mxu1 %v1013_v60 }
  0x79   :  { %817 = vmatprep.mubr.f32.mxu0 %v87_v6  ;;  %1020 = vmatpush3.bf16.msra.mxu0 %v1017_v2 }
  0x7a   :  { %1022 = vmatprep.subr.bf16.mxu0 %v1021_v7  ;;  %868 = vmatmul.mubr.f32.gmra.mrb[4].mxu1 %v84_v0 }
  0x7b   :  { %1047 = vmatpush3.bf16.msra.mxu1 %v1013_v60  ;;  %870 = vmatprep.mubr.f32.mxu1 %v85_v1 }
  0x7c   :  { %818 = vmatmul.mubr.f32.gmra.mrb[8].mxu0 %v88_v10  ;;  %1040 = vmatprep.subr.bf16.mxu1 %v1017_v2 }
  0x7d   :  { %820 = vmatprep.mubr.f32.mxu0 %v89_v11  ;;  %1024 = vmatpush3.bf16.msra.mxu0 %v1021_v7 }
  0x7e   :  { %1026 = vmatprep.subr.bf16.mxu0 %v1025_v12  ;;  %871 = vmatmul.mubr.f32.gmra.mrb[6].mxu1 %v86_v5 }
  0x7f   :  { %1048 = vmatpush3.bf16.msra.mxu1 %v1017_v2  ;;  %873 = vmatprep.mubr.f32.mxu1 %v87_v6 }
  0x80   :  { %821 = vmatmul.mubr.f32.gmra.mrb[10].mxu0 %v90_v15  ;;  %1041 = vmatprep.subr.bf16.mxu1 %v1021_v7 }
  0x81   :  { %823 = vmatprep.mubr.f32.mxu0 %v91_v16  ;;  %1028 = vmatpush3.bf16.msra.mxu0 %v1025_v12 }
  0x82   :  { %1030 = vmatprep.subr.bf16.mxu0 %v1029_v17  ;;  %874 = vmatmul.mubr.f32.gmra.mrb[8].mxu1 %v88_v10 }
  0x83   :  { %1049 = vmatpush3.bf16.msra.mxu1 %v1021_v7  ;;  %876 = vmatprep.mubr.f32.mxu1 %v89_v11 }
  0x84   :  { %824 = vmatmul.mubr.f32.gmra.mrb[12].mxu0 %v92_v18  ;;  %1042 = vmatprep.subr.bf16.mxu1 %v1025_v12 }
  0x85   :  { %826 = vmatprep.mubr.f32.mxu0 %v93_v19  ;;  %1032 = vmatpush3.bf16.msra.mxu0 %v1029_v17 }
  0x86   :  { %877 = vmatmul.mubr.f32.gmra.mrb[10].mxu1 %v90_v15  ;;  %1034 = vmatprep.subr.bf16.mxu0 %v1033_v23 }
  0x87   :  { %1050 = vmatpush3.bf16.msra.mxu1 %v1025_v12  ;;  %879 = vmatprep.mubr.f32.mxu1 %v91_v16 }
  0x88   :  { %827 = vmatmul.mubr.f32.gmra.mrb[14].mxu0 %v94_v20  ;;  %1043 = vmatprep.subr.bf16.mxu1 %v1029_v17 }
  0x89   :  { %1036 = vmatpush3.bf16.msra.mxu0 %v1033_v23 }
  0x8a   :  { %880 = vmatmul.mubr.f32.gmra.mrb[12].mxu1 %v92_v18  ;;  %v1334_v18 = vld [vmem:[%s1372_s5] ss:$0 sm:$0xff]  ;;  %s1200_s5 = smov [#allocation10]  }
  0x8b   :  { %1051 = vmatpush3.bf16.msra.mxu1 %v1029_v17  ;;  %882 = vmatprep.mubr.f32.mxu1 %v93_v19  ;;  %s661_s23 = sshll.u32 %s1200_s5, 4  ;;  %s662_s23 = int_to_ptr.vmem [resolvable:$true] %s661_s23 }
  0x8c   :  { %1044 = vmatprep.subr.bf16.mxu1 %v1033_v23  ;;  %s1164_s25 = scalar_lea.vmem %s662_s23, 2048  ;;  %p1169_p5 = scmp.lt.s32.totalorder %s662_s23, %s662_s23 }
  0x8d   :  { %p1165_p4 = scmp.ne.s32.totalorder %s662_s23, %s1164_s25  ;;  %p1170_p6 = scmp.lt.s32.totalorder %s1164_s25, %s1164_s25 }
  0x8e   :  { %883 = vmatmul.mubr.f32.gmra.mrb[14].mxu1 %v94_v20 }
  0x8f   :  { %1052 = vmatpush3.bf16.msra.mxu1 %v1033_v23  ;;  %p1171_p7 = por %p1170_p6, %p1169_p5 }
  0x91   :  { %p1172_p8 = pnand %p1171_p7, %p1165_p4 }
 0x13f   :  { %v807_v25 = vpop.f32.mrb[0].mxu0 }
 0x140   :  { %v190_v26 = vadd.f32 %v807_v25, %v1313_v24  ;;  %v184_v27 = vpop.f32.mrb[1].mxu0 }
 0x141   :  { %v185_v28 = vadd.f32 %v1313_v24, %v184_v27 }
 0x142   :  { %v264_v31 = vmax.f32 %v190_v26, 0.0 }
 0x143   :  { %v263_v29 = vmax.f32 %v185_v28, 0.0  ;;  %v810_v30 = vpop.f32.mrb[2].mxu0 }
 0x144   :  { %v200_v32 = vadd.f32 %v810_v30, %v1313_v24  ;;  %v194_v33 = vpop.f32.mrb[3].mxu0 }
 0x145   :  { %v195_v34 = vadd.f32 %v1313_v24, %v194_v33  ;;  %917 = vmatprep.mubr.f32.mxu0 %v263_v29  ;;  %v863_v41 = vpop.f32.mrb[0].mxu1 }
 0x146   :  { %918 = vmatmul.mubr.f32.vlgmr.msra.gmra.mrb[16].mxu0 %v264_v31  ;;  %v266_v37 = vmax.f32 %v200_v32, 0.0  ;;  %v377_v44 = vpop.f32.mrb[1].mxu1 }
 0x147   :  { %v265_v35 = vmax.f32 %v195_v34, 0.0  ;;  %v813_v36 = vpop.f32.mrb[4].mxu0 }
 0x148   :  { %v210_v38 = vadd.f32 %v813_v36, %v1313_v24  ;;  %v204_v39 = vpop.f32.mrb[5].mxu0 }
 0x149   :  { %v205_v40 = vadd.f32 %v1313_v24, %v204_v39  ;;  %920 = vmatprep.mubr.f32.mxu0 %v265_v35  ;;  %v866_v49 = vpop.f32.mrb[2].mxu1 }
 0x14a   :  { %921 = vmatmul.mubr.f32.gmra.mrb[18].mxu0 %v266_v37  ;;  %v268_v45 = vmax.f32 %v210_v38, 0.0  ;;  %v387_v52 = vpop.f32.mrb[3].mxu1 }
 0x14b   :  { %v267_v42 = vmax.f32 %v205_v40, 0.0  ;;  %v816_v43 = vpop.f32.mrb[6].mxu0 }
 0x14c   :  { %v220_v46 = vadd.f32 %v816_v43, %v1313_v24  ;;  %v214_v47 = vpop.f32.mrb[7].mxu0 }
 0x14d   :  { %v215_v48 = vadd.f32 %v1313_v24, %v214_v47  ;;  %923 = vmatprep.mubr.f32.mxu0 %v267_v42  ;;  %v869_v57 = vpop.f32.mrb[4].mxu1 }
 0x14e   :  { %924 = vmatmul.mubr.f32.gmra.mrb[20].mxu0 %v268_v45  ;;  %v270_v53 = vmax.f32 %v220_v46, 0.0  ;;  %v397_v60 = vpop.f32.mrb[5].mxu1 }
 0x14f   :  { %v269_v50 = vmax.f32 %v215_v48, 0.0  ;;  %v819_v51 = vpop.f32.mrb[8].mxu0 }
 0x150   :  { %v230_v54 = vadd.f32 %v819_v51, %v1313_v24  ;;  %v224_v55 = vpop.f32.mrb[9].mxu0 }
 0x151   :  { %v225_v56 = vadd.f32 %v1313_v24, %v224_v55  ;;  %926 = vmatprep.mubr.f32.mxu0 %v269_v50  ;;  %v872_v1 = vpop.f32.mrb[6].mxu1 }
 0x152   :  { %927 = vmatmul.mubr.f32.gmra.mrb[22].mxu0 %v270_v53  ;;  %v272_v61 = vmax.f32 %v230_v54, 0.0  ;;  %v407_v4 = vpop.f32.mrb[7].mxu1 }
 0x153   :  { %v271_v58 = vmax.f32 %v225_v56, 0.0  ;;  %v822_v59 = vpop.f32.mrb[10].mxu0 }
 0x154   :  { %v240_v62 = vadd.f32 %v822_v59, %v1313_v24  ;;  %v234_v63 = vpop.f32.mrb[11].mxu0 }
 0x155   :  { %v235_v0 = vadd.f32 %v1313_v24, %v234_v63  ;;  %929 = vmatprep.mubr.f32.mxu1 %v271_v58 }
 0x156   :  { %930 = vmatmul.mubr.f32.vlgmr.msra.gmra.mrb[8].mxu1 %v272_v61  ;;  %v274_v5 = vmax.f32 %v240_v62, 0.0 }
 0x157   :  { %v273_v2 = vmax.f32 %v235_v0, 0.0  ;;  %v825_v3 = vpop.f32.mrb[12].mxu0 }
 0x158   :  { %v250_v6 = vadd.f32 %v825_v3, %v1313_v24  ;;  %v244_v7 = vpop.f32.mrb[13].mxu0 }
 0x159   :  { %v245_v8 = vadd.f32 %v1313_v24, %v244_v7  ;;  %932 = vmatprep.mubr.f32.mxu1 %v273_v2 }
 0x15a   :  { %933 = vmatmul.mubr.f32.gmra.mrb[10].mxu1 %v274_v5  ;;  %v276_v11 = vmax.f32 %v250_v6, 0.0 }
 0x15b   :  { %v275_v9 = vmax.f32 %v245_v8, 0.0  ;;  %v828_v10 = vpop.f32.mrb[14].mxu0 }
 0x15c   :  { %v260_v12 = vadd.f32 %v828_v10, %v1313_v24  ;;  %v254_v13 = vpop.f32.mrb[15].mxu0 }
 0x15d   :  { %v255_v14 = vadd.f32 %v1313_v24, %v254_v13  ;;  %935 = vmatprep.mubr.f32.mxu1 %v275_v9 }
 0x15e   :  { %936 = vmatmul.mubr.f32.gmra.mrb[12].mxu1 %v276_v11  ;;  %v278_v16 = vmax.f32 %v260_v12, 0.0 }
 0x15f   :  { %v277_v15 = vmax.f32 %v255_v14, 0.0 }
 0x161   :  { %938 = vmatprep.mubr.f32.mxu1 %v277_v15 }
 0x162   :  { %939 = vmatmul.mubr.f32.gmra.mrb[14].mxu1 %v278_v16 }
 0x219   :  { %v919_v17 = vpop.f32.mrb[16].mxu0 }
 0x21a   :  { %v528_v19 = vadd.f32 %v919_v17, %v863_v41  ;;  %v522_v20 = vpop.f32.mrb[17].mxu0 }
 0x21b   :  { %v523_v21 = vadd.f32 %v522_v20, %v377_v44 }
 0x21c   :  { %v609_v22 = vadd.f32 %v1334_v18, %v528_v19 }
 0x21d   :  { %v608_v23 = vadd.f32 %v1334_v18, %v523_v21  ;;  %v922_v24 = vpop.f32.mrb[18].mxu0 }
 0x21e   :  { %v625_v25 = vmax.f32 %v609_v22, 0.0  ;;  %v538_v26 = vadd.f32 %v922_v24, %v866_v49  ;;  %v532_v27 = vpop.f32.mrb[19].mxu0 }
 0x21f   :  { %v624_v28 = vmax.f32 %v608_v23, 0.0  ;;  %v533_v29 = vadd.f32 %v532_v27, %v387_v52 }
 0x220   :  { %641 = vst [vmem:[#allocation10 + $0x8] sm:$0xff] %v625_v25  ;;  %v611_v30 = vadd.f32 %v1334_v18, %v538_v26 }
 0x221   :  { %640 = vst [vmem:[#allocation10] sm:$0xff] %v624_v28  ;;  %v610_v31 = vadd.f32 %v1334_v18, %v533_v29  ;;  %v925_v32 = vpop.f32.mrb[20].mxu0 }
 0x222   :  { %v627_v33 = vmax.f32 %v611_v30, 0.0  ;;  %v548_v34 = vadd.f32 %v925_v32, %v869_v57  ;;  %v542_v35 = vpop.f32.mrb[21].mxu0 }
 0x223   :  { %v626_v36 = vmax.f32 %v610_v31, 0.0  ;;  %v543_v37 = vadd.f32 %v542_v35, %v397_v60 }
 0x224   :  { %643 = vst [vmem:[#allocation10 + $0x18] sm:$0xff] %v627_v33  ;;  %v613_v38 = vadd.f32 %v1334_v18, %v548_v34 }
 0x225   :  { %642 = vst [vmem:[#allocation10 + $0x10] sm:$0xff] %v626_v36  ;;  %v612_v39 = vadd.f32 %v1334_v18, %v543_v37  ;;  %v928_v40 = vpop.f32.mrb[22].mxu0 }
 0x226   :  { %v629_v41 = vmax.f32 %v613_v38, 0.0  ;;  %v558_v42 = vadd.f32 %v928_v40, %v872_v1  ;;  %v552_v43 = vpop.f32.mrb[23].mxu0 }
 0x227   :  { %v628_v44 = vmax.f32 %v612_v39, 0.0  ;;  %v553_v45 = vadd.f32 %v552_v43, %v407_v4 }
 0x228   :  { %645 = vst [vmem:[#allocation10 + $0x28] sm:$0xff] %v629_v41  ;;  %v615_v46 = vadd.f32 %v1334_v18, %v558_v42 }
 0x229   :  { %644 = vst [vmem:[#allocation10 + $0x20] sm:$0xff] %v628_v44  ;;  %v614_v47 = vadd.f32 %v1334_v18, %v553_v45  ;;  %v931_v48 = vpop.f32.mrb[8].mxu1 }
 0x22a   :  { %v631_v49 = vmax.f32 %v615_v46, 0.0  ;;  %v617_v50 = vadd.f32 %v931_v48, %v1334_v18  ;;  %v562_v51 = vpop.f32.mrb[9].mxu1 }
 0x22b   :  { %v630_v52 = vmax.f32 %v614_v47, 0.0  ;;  %v616_v53 = vadd.f32 %v1334_v18, %v562_v51 }
 0x22c   :  { %647 = vst [vmem:[#allocation10 + $0x38] sm:$0xff] %v631_v49  ;;  %v633_v54 = vmax.f32 %v617_v50, 0.0 }
 0x22d   :  { %646 = vst [vmem:[#allocation10 + $0x30] sm:$0xff] %v630_v52  ;;  %v632_v55 = vmax.f32 %v616_v53, 0.0  ;;  %v934_v56 = vpop.f32.mrb[10].mxu1 }
 0x22e   :  { %649 = vst [vmem:[#allocation10 + $0x48] sm:$0xff] %v633_v54  ;;  %v619_v57 = vadd.f32 %v934_v56, %v1334_v18  ;;  %v572_v58 = vpop.f32.mrb[11].mxu1 }
 0x22f   :  { %648 = vst [vmem:[#allocation10 + $0x40] sm:$0xff] %v632_v55  ;;  %v618_v59 = vadd.f32 %v1334_v18, %v572_v58 }
 0x230   :  { %v635_v60 = vmax.f32 %v619_v57, 0.0 }
 0x231   :  { %v634_v61 = vmax.f32 %v618_v59, 0.0  ;;  %v937_v62 = vpop.f32.mrb[12].mxu1 }
 0x232   :  { %651 = vst [vmem:[#allocation10 + $0x58] sm:$0xff] %v635_v60  ;;  %v621_v63 = vadd.f32 %v937_v62, %v1334_v18  ;;  %v582_v0 = vpop.f32.mrb[13].mxu1 }
 0x233   :  { %650 = vst [vmem:[#allocation10 + $0x50] sm:$0xff] %v634_v61  ;;  %v620_v1 = vadd.f32 %v1334_v18, %v582_v0 }
 0x234   :  { %v637_v2 = vmax.f32 %v621_v63, 0.0 }
 0x235   :  { %v636_v3 = vmax.f32 %v620_v1, 0.0  ;;  %v940_v4 = vpop.f32.mrb[14].mxu1 }
 0x236   :  { %653 = vst [vmem:[#allocation10 + $0x68] sm:$0xff] %v637_v2  ;;  %v623_v5 = vadd.f32 %v940_v4, %v1334_v18  ;;  %v592_v6 = vpop.f32.mrb[15].mxu1 }
 0x237   :  { %652 = vst [vmem:[#allocation10 + $0x60] sm:$0xff] %v636_v3  ;;  %v622_v7 = vadd.f32 %v1334_v18, %v592_v6 }
 0x238   :  { %v639_v8 = vmax.f32 %v623_v5, 0.0 }
 0x239   :  { %v638_v9 = vmax.f32 %v622_v7, 0.0 }
 0x23a   :  { %655 = vst [vmem:[#allocation10 + $0x78] sm:$0xff] %v639_v8 }
 0x23b   :  { %654 = vst [vmem:[#allocation10 + $0x70] sm:$0xff] %v638_v9 }
 0x23c   :  { %1175 = shalt.err (!%p1172_p8)
}
 0x23d   :  { %s1176_s28 = scalar_lea.hbm %s1373_s6, 2048 }
 0x23e   :  { %p1177_p9 = scmp.ne.s32.totalorder %s1373_s6, %s1176_s28  ;;  %p1180_p10 = scmp.lt.u32.totalorder %s1176_s28, %s1373_s6 }
 0x240   :  { %p1182_p11 = pnand %p1180_p10, %p1177_p9 }
 0x242   :  { %1185 = shalt.err (!%p1182_p11)
}
 0x243   :  { %667 = dma.vmem_to_hbm [thread:$0]  %s662_s23, 2048, %s1373_s6, [#allocation4], %s1196_s9, %s1196_s9, %s1197_s10  }
 0x244   :  { %1192 = dma.done.wait [#allocation4], 2048  }
 0x245   :  { %1193 = vsyncadd [#allocation4], 4294965248 }
 0x246   :  { %671 = vsyncpa [#allocation3], 1 }
 0x247   :  { %672 = vsyncpa [#allocation6], 1 }
 0x248   :  { %673 = vsyncpa [#allocation9], 1 }
 0x249   :  { %674 = vsyncpa [#allocation4], 1 }

</bundles_post_ra>
